<compile_context>
chip_gen: v6e
topology: v6e:2x2x1
jax: 0.10.0
libtpu: 0.0.40
codegen_flags: <defaults>
</compile_context>

<pallas_src>
import jax
import jax.numpy as jnp
import numpy as np
from jax.experimental import pallas as pl
from jax.experimental.pallas import tpu as pltpu


def _round_up(x, m):
    return ((x + m - 1) // m) * m


def choose_pack(hidden_dim):
    """Tokens packed per kernel row so a row is >= 128 lanes, via a free reshape."""
    if hidden_dim < 128 and 128 % hidden_dim == 0:
        return 128 // hidden_dim
    return 1


def _dense_block_diag(w_blocks, repeat=1):
    """(B, bs, bs) block weights -> dense block-diagonal (repeat*B*bs, repeat*B*bs).

    Direct scatter (no (B, bs, B, bs) intermediate).  Intended to run once per
    weight update (cache the result), not on every forward call.
    """
    B, bs, _ = w_blocks.shape
    H = B * bs
    out = jnp.zeros((repeat * H, repeat * H), w_blocks.dtype)

    def body(i, acc):
        k = i // B
        b = i % B
        off = k * H + b * bs
        return jax.lax.dynamic_update_slice(acc, w_blocks[b], (off, off))

    return jax.lax.fori_loop(0, repeat * B, body, out)


def prepare_weights(w_real, w_imag, *, pack=1, compute_dtype=jnp.float32):
    """Densify the block-diagonal complex weight ONCE; cache across forward calls."""
    wr = _dense_block_diag(w_real.astype(jnp.float32), repeat=pack)
    wi = _dense_block_diag(w_imag.astype(jnp.float32), repeat=pack)
    return wr.astype(compute_dtype), wi.astype(compute_dtype)


def _cblock_kernel(wr_ref, wi_ref, xr_ref, xi_ref, or_ref, oi_ref):
    xr = xr_ref[...]
    xi = xi_ref[...]
    wr = wr_ref[...]
    wi = wi_ref[...]
    # Complex block-diagonal matmul as 4 real MXU matmuls with f32 accumulation.
    o_r = (jnp.dot(xr, wr, preferred_element_type=jnp.float32)
           - jnp.dot(xi, wi, preferred_element_type=jnp.float32))
    o_i = (jnp.dot(xr, wi, preferred_element_type=jnp.float32)
           + jnp.dot(xi, wr, preferred_element_type=jnp.float32))
    or_ref[...] = o_r.astype(or_ref.dtype)
    oi_ref[...] = o_i.astype(oi_ref.dtype)


def complex_block_linear(x_real, x_imag, wr_packed, wi_packed, *, pack=1,
                         tile_rows=None, compute_dtype=jnp.float32):
    """Forward pass of ComplexBlockLinear.

    x_real/x_imag: float [..., hidden]
    wr_packed/wi_packed: dense block-diagonal weights from prepare_weights(...),
        each of shape (pack*hidden, pack*hidden).
    Returns (out_real, out_imag) with the same shape/dtype as x_real.
    """
    lead = x_real.shape[:-1]
    hidden = x_real.shape[-1]
    row_w = pack * hidden
    assert wr_packed.shape == (row_w, row_w) and wi_packed.shape == (row_w, row_w)
    out_dtype = x_real.dtype
    N = int(np.prod(lead)) if lead else 1
    if N == 0:                                   # degenerate-shape guard
        z = jnp.zeros(x_real.shape, out_dtype)
        return z, z

    xr = x_real.reshape(N, hidden).astype(compute_dtype)
    xi = x_imag.reshape(N, hidden).astype(compute_dtype)

    # Token packing: a free, contiguous reshape in the common case N % pack == 0.
    tail = (-N) % pack
    if tail:
        # TODO(synk): handle the <pack leftover tokens with a second tiny call
        # instead of this (full-copy) pad; only triggers when N % pack != 0.
        xr = jnp.pad(xr, ((0, tail), (0, 0)))
        xi = jnp.pad(xi, ((0, tail), (0, 0)))
    rows = (N + tail) // pack
    xr = xr.reshape(rows, row_w)
    xi = xi.reshape(rows, row_w)

    elem = jnp.dtype(compute_dtype).itemsize

    # VMEM budget for (double-buffered) weight + activation tiles.  40 MiB keeps us
    # comfortably under v7x's 64 MiB/core; the explicit limit below also overrides
    # v5e's ~16 MiB default scoped limit.
    TILE_BUDGET = 40 << 20
    weight_vmem = 2 * 2 * row_w * row_w * elem   # Wr + Wi, double-buffered by default
    # TODO(synk): for large hidden the dense weight stops fitting VMEM (and the
    # densification FLOPs stop being free); tile the contraction dim with an
    # 'arbitrary' accumulator grid axis there instead of densifying whole.
    assert weight_vmem <= TILE_BUDGET // 2, (
        "dense block-diagonal weight too large for the single-pass kernel")

    if tile_rows is None:
        act_budget = TILE_BUDGET - weight_vmem
        # 4 activation tiles (xr, xi, or, oi), each double-buffered.
        max_tile_rows = max(8, ((act_budget // (2 * 4 * row_w * elem)) // 8) * 8)
        # Aim for >= ~8 grid steps when there is enough work (2 TensorCores x >=4
        # steps each keeps input/output DMAs overlapped on megacore parts).
        want = _round_up(pl.cdiv(rows, 8), 8)
        tile_rows = min(max_tile_rows, max(8, want))
    tile_rows = int(tile_rows)
    if rows <= tile_rows:
        tile_rows = rows                      # single full-extent block: always legal
    else:
        tile_rows = max(8, (tile_rows // 8) * 8)
    grid = (pl.cdiv(rows, tile_rows),)        # ragged last block is masked by Pallas

    w_spec = pl.BlockSpec((row_w, row_w), lambda i: (0, 0))    # VMEM-resident weight
    x_spec = pl.BlockSpec((tile_rows, row_w), lambda i: (i, 0))

    vmem_limit = 48 << 20   # explicit: > v5e's 16 MiB default, < v7x's 64 MiB VMEM

    out_r, out_i = pl.pallas_call(
        _cblock_kernel,
        out_shape=(jax.ShapeDtypeStruct((rows, row_w), out_dtype),
                   jax.ShapeDtypeStruct((rows, row_w), out_dtype)),
        grid_spec=pltpu.PrefetchScalarGridSpec(
            num_scalar_prefetch=0,
            grid=grid,
            in_specs=[w_spec, w_spec, x_spec, x_spec],
            out_specs=[x_spec, x_spec],
        ),
        compiler_params=pltpu.CompilerParams(
            dimension_semantics=("parallel",),
            vmem_limit_bytes=vmem_limit),
    )(wr_packed.astype(compute_dtype), wi_packed.astype(compute_dtype), xr, xi)

    # Unpack tokens (free reshape), drop the pad tail if any, restore leading dims.
    out_r = out_r.reshape(rows * pack, hidden)
    out_i = out_i.reshape(rows * pack, hidden)
    if tail:
        out_r = out_r[:N]
        out_i = out_i[:N]
    return out_r.reshape(*lead, hidden), out_i.reshape(*lead, hidden)


if __name__ == "__main__":
    # Module config (small): hidden_dim=32, cmlp_diagonal_blocks=8 -> block_size=4
    hidden_dim = 32
    blocks = 8
    block_size = hidden_dim // blocks
    scale = 0.02

    key = jax.random.PRNGKey(0)
    k_xr, k_xi, k_wr, k_wi = jax.random.split(key, 4)

    # x: complex, shape (batch=2, seq=16, hidden=32), represented as real/imag f32.
    x_shape = (2, 16, hidden_dim)
    x_real = jax.random.normal(k_xr, x_shape, dtype=jnp.float32)
    x_imag = jax.random.normal(k_xi, x_shape, dtype=jnp.float32)

    # weight ~ scale * randn(blocks, bs, bs, cfloat): real/imag each std scale/sqrt(2)
    w_std = scale / np.sqrt(2.0)
    w_real = w_std * jax.random.normal(k_wr, (blocks, block_size, block_size),
                                       dtype=jnp.float32)
    w_imag = w_std * jax.random.normal(k_wi, (blocks, block_size, block_size),
                                       dtype=jnp.float32)

    # Weight prep happens ONCE (cache across forward calls).
    pack = choose_pack(hidden_dim)                     # hidden=32 -> pack=4 (128 lanes)
    wr_p, wi_p = prepare_weights(w_real, w_imag, pack=pack)
    wr_p = jax.block_until_ready(wr_p)
    wi_p = jax.block_until_ready(wi_p)

    out_r, out_i = complex_block_linear(x_real, x_imag, wr_p, wi_p, pack=pack)
    out_r = jax.block_until_ready(out_r)
    out_i = jax.block_until_ready(out_i)

    # Pure-JAX complex reference (mirrors the torch.einsum exactly).
    xc = (x_real + 1j * x_imag).astype(jnp.complex64)
    wc = (w_real + 1j * w_imag).astype(jnp.complex64)
    xb = xc.reshape(*x_shape[:-1], blocks, block_size)
    ref = jnp.einsum('...bi,bio->...bo', xb, wc).reshape(*x_shape[:-1], hidden_dim)

    np.testing.assert_allclose(np.asarray(out_r), np.asarray(ref.real),
                               rtol=1e-5, atol=1e-5)
    np.testing.assert_allclose(np.asarray(out_i), np.asarray(ref.imag),
                               rtol=1e-5, atol=1e-5)

    print("KERNEL_OK")
</pallas_src>

<mosaic_0001>
module attributes {stable_mosaic.version = 11 : i64} {
  func.func @_cblock_kernel(%arg0: i32, %arg1: memref<128x128xf32, #tpu.memory_space<vmem>>, %arg2: memref<128x128xf32, #tpu.memory_space<vmem>>, %arg3: memref<8x128xf32, #tpu.memory_space<vmem>>, %arg4: memref<8x128xf32, #tpu.memory_space<vmem>>, %arg5: memref<8x128xf32, #tpu.memory_space<vmem>>, %arg6: memref<8x128xf32, #tpu.memory_space<vmem>>) attributes {dimension_semantics = [#tpu.dimension_semantics<parallel>], iteration_bounds = array<i64: 1>, scalar_prefetch = 0 : i64, scratch_operands = 0 : i64, tpu.core_type = #tpu.core_type<tc>, window_params = [{pipeline_mode = #tpu.pipeline_mode<synchronous>, transform_indices = @transform_0, window_bounds = array<i64: 128, 128>}, {pipeline_mode = #tpu.pipeline_mode<synchronous>, transform_indices = @transform_1, window_bounds = array<i64: 128, 128>}, {transform_indices = @transform_2, window_bounds = array<i64: 8, 128>}, {transform_indices = @transform_3, window_bounds = array<i64: 8, 128>}, {transform_indices = @transform_4, window_bounds = array<i64: 8, 128>}, {transform_indices = @transform_5, window_bounds = array<i64: 8, 128>}]} {
    %c0 = arith.constant 0 : index
    %c0_0 = arith.constant 0 : index
    %0 = vector.load %arg3[%c0, %c0_0] : memref<8x128xf32, #tpu.memory_space<vmem>>, vector<8x128xf32>
    %c0_1 = arith.constant 0 : index
    %c0_2 = arith.constant 0 : index
    %1 = vector.load %arg4[%c0_1, %c0_2] : memref<8x128xf32, #tpu.memory_space<vmem>>, vector<8x128xf32>
    %c0_3 = arith.constant 0 : index
    %c0_4 = arith.constant 0 : index
    %2 = vector.load %arg1[%c0_3, %c0_4] : memref<128x128xf32, #tpu.memory_space<vmem>>, vector<128x128xf32>
    %c0_5 = arith.constant 0 : index
    %c0_6 = arith.constant 0 : index
    %3 = vector.load %arg2[%c0_5, %c0_6] : memref<128x128xf32, #tpu.memory_space<vmem>>, vector<128x128xf32>
    %cst = arith.constant dense<0.000000e+00> : vector<8x128xf32>
    %4 = tpu.matmul %0, %2, %cst {dimension_numbers = #tpu.dot_dimension_numbers<[1], [0], [0], [1], [0, 0, 1, 1], [], []>} : vector<8x128xf32>, vector<128x128xf32>, vector<8x128xf32> -> vector<8x128xf32>
    %cst_7 = arith.constant dense<0.000000e+00> : vector<8x128xf32>
    %5 = tpu.matmul %1, %3, %cst_7 {dimension_numbers = #tpu.dot_dimension_numbers<[1], [0], [0], [1], [0, 0, 1, 1], [], []>} : vector<8x128xf32>, vector<128x128xf32>, vector<8x128xf32> -> vector<8x128xf32>
    %6 = arith.subf %4, %5 : vector<8x128xf32>
    %cst_8 = arith.constant dense<0.000000e+00> : vector<8x128xf32>
    %7 = tpu.matmul %0, %3, %cst_8 {dimension_numbers = #tpu.dot_dimension_numbers<[1], [0], [0], [1], [0, 0, 1, 1], [], []>} : vector<8x128xf32>, vector<128x128xf32>, vector<8x128xf32> -> vector<8x128xf32>
    %cst_9 = arith.constant dense<0.000000e+00> : vector<8x128xf32>
    %8 = tpu.matmul %1, %2, %cst_9 {dimension_numbers = #tpu.dot_dimension_numbers<[1], [0], [0], [1], [0, 0, 1, 1], [], []>} : vector<8x128xf32>, vector<128x128xf32>, vector<8x128xf32> -> vector<8x128xf32>
    %9 = arith.addf %7, %8 : vector<8x128xf32>
    %c0_10 = arith.constant 0 : index
    %c0_11 = arith.constant 0 : index
    %10 = vector.load %arg5[%c0_10, %c0_11] : memref<8x128xf32, #tpu.memory_space<vmem>>, vector<8x128xf32>
    tpu.vector_store %arg5[%c0_10, %c0_11], %6 {strides = array<i32>} : memref<8x128xf32, #tpu.memory_space<vmem>>, vector<8x128xf32>,
    %c0_12 = arith.constant 0 : index
    %c0_13 = arith.constant 0 : index
    %11 = vector.load %arg6[%c0_12, %c0_13] : memref<8x128xf32, #tpu.memory_space<vmem>>, vector<8x128xf32>
    tpu.vector_store %arg6[%c0_12, %c0_13], %9 {strides = array<i32>} : memref<8x128xf32, #tpu.memory_space<vmem>>, vector<8x128xf32>,
    return
  }
  func.func @transform_0(%arg0: i32) -> (i32, i32) {
    %c0_i32 = arith.constant 0 : i32
    %c0_i32_0 = arith.constant 0 : i32
    %c0_i32_1 = arith.constant 0 : i32
    return %c0_i32, %c0_i32_0 : i32, i32
  }
  func.func @transform_1(%arg0: i32) -> (i32, i32) {
    %c0_i32 = arith.constant 0 : i32
    %c0_i32_0 = arith.constant 0 : i32
    %c0_i32_1 = arith.constant 0 : i32
    return %c0_i32, %c0_i32_0 : i32, i32
  }
  func.func @transform_2(%arg0: i32) -> (i32, i32) {
    %c0_i32 = arith.constant 0 : i32
    %c0_i32_0 = arith.constant 0 : i32
    return %arg0, %c0_i32 : i32, i32
  }
  func.func @transform_3(%arg0: i32) -> (i32, i32) {
    %c0_i32 = arith.constant 0 : i32
    %c0_i32_0 = arith.constant 0 : i32
    return %arg0, %c0_i32 : i32, i32
  }
  func.func @transform_4(%arg0: i32) -> (i32, i32) {
    %c0_i32 = arith.constant 0 : i32
    %c0_i32_0 = arith.constant 0 : i32
    return %arg0, %c0_i32 : i32, i32
  }
  func.func @transform_5(%arg0: i32) -> (i32, i32) {
    %c0_i32 = arith.constant 0 : i32
    %c0_i32_0 = arith.constant 0 : i32
    return %arg0, %c0_i32 : i32, i32
  }
}

</mosaic_0001>

<bundles_post_ra>
// kernel: tpu_custom_call.1
= control target key start
LH: loop header
LB: loop body
LE: loop exit
PB: predicated region body
PF: predicated region fallthrough
CT: control target
= control target key end

     0   :  { %11 = vsyncpa [#allocation3], 0  ;;  %s1034_s0 = inlined_call_operand.hbm [shape: f32[128,128], index: 0, kind: input, shape index: {}]   ;;  %s1035_s1 = inlined_call_operand.hbm [shape: f32[128,128], index: 1, kind: input, shape index: {}]   ;;  %s1036_s2 = inlined_call_operand.hbm [shape: f32[8,128], index: 2, kind: input, shape index: {}]   ;;  %s1037_s3 = inlined_call_operand.hbm [shape: f32[8,128], index: 3, kind: input, shape index: {}]   ;;  %s1038_s4 = inlined_call_operand.hbm [shape: f32[8,128], index: 4, kind: output, shape index: {0}]   ;;  %s1039_s5 = inlined_call_operand.hbm [shape: f32[8,128], index: 5, kind: output, shape index: {1}]  }
   0x1   :  { %12 = vsyncpa [#allocation6], 0 }
   0x2   :  { %13 = vsyncpa [#allocation9], 0 }
   0x3   :  { %14 = vsyncpa [#allocation4], 0 }
   0x4   :  { %15 = vsyncpa [#allocation12], 0  ;;  %s768_s18 = smov [#allocation5]   ;;  %s769_s20 = smov [#allocation2]  }
   0x5   :  { %s33_s19 = sshll.u32 %s768_s18, 4  ;;  %s21_s21 = sshll.u32 %s769_s20, 4  ;;  %s34_s19 = int_to_ptr.vmem [resolvable:$true] %s33_s19  ;;  %s22_s21 = int_to_ptr.vmem [resolvable:$true] %s21_s21 }
   0x6   :  { %s646_s22 = scalar_lea.vmem %s34_s19, 2048  ;;  %p651_p1 = scmp.lt.s32.totalorder %s34_s19, %s34_s19 }
   0x7   :  { %p647_p0 = scmp.ne.s32.totalorder %s34_s19, %s646_s22  ;;  %p652_p2 = scmp.lt.s32.totalorder %s646_s22, %s646_s22 }
   0x9   :  { %p653_p3 = por %p652_p2, %p651_p1 }
   0xb   :  { %p654_p4 = pnand %p653_p3, %p647_p0 }
   0xd   :  { %657 = shalt.err (!%p654_p4)
}
   0xe   :  { %s770_s23 = smov 128   ;;  %s771_s24 = smov 8  }
   0xf   :  { %39 = dma.hbm_to_vmem [thread:$0]  %s1035_s1, 2048, %s34_s19, [#allocation6], %s770_s23, %s770_s23, %s771_s24  }
  0x10   :  { %s666_s27 = scalar_lea.vmem %s22_s21, 2048  ;;  %p671_p6 = scmp.lt.s32.totalorder %s22_s21, %s22_s21 }
  0x11   :  { %p667_p5 = scmp.ne.s32.totalorder %s22_s21, %s666_s27  ;;  %p672_p7 = scmp.lt.s32.totalorder %s666_s27, %s666_s27 }
  0x13   :  { %p673_p8 = por %p672_p7, %p671_p6 }
  0x15   :  { %p674_p9 = pnand %p673_p8, %p667_p5 }
  0x17   :  { %677 = shalt.err (!%p674_p9)
}
  0x18   :  { %27 = dma.hbm_to_vmem [thread:$0]  %s1034_s0, 2048, %s22_s21, [#allocation3], %s770_s23, %s770_s23, %s771_s24  }
  0x19   :  { %s772_s30 = smov [#allocation7]   ;;  %s773_s7 = smov [#allocation8]  }
  0x1a   :  { %s46_s6 = sshll.u32 %s772_s30, 4  ;;  %s56_s8 = sshll.u32 %s773_s7, 4  ;;  %s47_s6 = int_to_ptr.vmem [resolvable:$true] %s46_s6  ;;  %s57_s8 = int_to_ptr.vmem [resolvable:$true] %s56_s8 }
  0x1b   :  { %s686_s9 = scalar_lea.vmem %s47_s6, 128  ;;  %p691_p11 = scmp.lt.s32.totalorder %s47_s6, %s47_s6 }
  0x1c   :  { %p687_p10 = scmp.ne.s32.totalorder %s47_s6, %s686_s9  ;;  %p692_p12 = scmp.lt.s32.totalorder %s686_s9, %s686_s9 }
  0x1e   :  { %p693_p13 = por %p692_p12, %p691_p11 }
  0x20   :  { %p694_p0 = pnand %p693_p13, %p687_p10 }
  0x22   :  { %697 = shalt.err (!%p694_p0)
}
  0x23   :  { %49 = dma.hbm_to_vmem [thread:$0]  %s1036_s2, 128, %s47_s6, [#allocation6]  }
  0x24   :  { %s706_s11 = scalar_lea.vmem %s57_s8, 128  ;;  %p711_p2 = scmp.lt.s32.totalorder %s57_s8, %s57_s8 }
  0x25   :  { %p707_p1 = scmp.ne.s32.totalorder %s57_s8, %s706_s11  ;;  %p712_p3 = scmp.lt.s32.totalorder %s706_s11, %s706_s11 }
  0x27   :  { %p713_p4 = por %p712_p3, %p711_p2 }
  0x29   :  { %p714_p5 = pnand %p713_p4, %p707_p1 }
  0x2b   :  { %717 = shalt.err (!%p714_p5)
}
  0x2c   :  { %59 = dma.hbm_to_vmem [thread:$0]  %s1037_s3, 128, %s57_s8, [#allocation9]  }
  0x2d   :  { %758 = dma.done.wait [#allocation3], 2048  }
  0x2e   :  { %759 = vsyncadd [#allocation3], 4294965248 }
  0x2f   :  { %760 = dma.done.wait [#allocation6], 2176  }
  0x30   :  { %761 = vsyncadd [#allocation6], 4294965120 }
  0x31   :  { %762 = dma.done.wait [#allocation9], 128  }
  0x32   :  { %763 = vsyncadd [#allocation9], 4294967168  ;;  %v774_v0 = vmov 0.0   ;;  %vm775_vm0 = vmmov 0   ;;  %v826_v1 = vld [vmem:[#allocation2 + $0x78] sm:$0xff]  ;;  %v830_v3 = vld [vmem:[#allocation2 + $0x70] sm:$0xff] }
  0x33   :  { %488 = vmatprep.subr.mxu0 %v774_v0  ;;  %523 = vmatprep.subr.mxu1 %v774_v0  ;;  %v828_v2 = vld [vmem:[#allocation5 + $0x78] sm:$0xff]  ;;  %v834_v4 = vld [vmem:[#allocation5 + $0x70] sm:$0xff]  ;;  %v838_v5 = vld [vmem:[#allocation2 + $0x68] sm:$0xff]  ;;  %s776_s2 = smov [#allocation10]  }
  0x34   :  { %520 = vmatprep.mubr.msk.f32.mxu0 %vm775_vm0, %v774_v0  ;;  %555 = vmatprep.mubr.msk.f32.mxu1 %vm775_vm0, %v774_v0  ;;  %v840_v6 = vld [vmem:[#allocation5 + $0x68] sm:$0xff]  ;;  %v846_v7 = vld [vmem:[#allocation2 + $0x60] sm:$0xff]  ;;  %v854_v9 = vld [vmem:[#allocation2 + $0x58] sm:$0xff]  ;;  %s395_s3 = sshll.u32 %s776_s2, 4  ;;  %s396_s3 = int_to_ptr.vmem [resolvable:$true] %s395_s3 }
  0x35   :  { %489 = vmatpush3.msra.mxu0 %v826_v1  ;;  %524 = vmatpush3.msra.mxu1 %v828_v2  ;;  %v848_v8 = vld [vmem:[#allocation5 + $0x60] sm:$0xff]  ;;  %v856_v10 = vld [vmem:[#allocation5 + $0x58] sm:$0xff]  ;;  %v862_v11 = vld [vmem:[#allocation2 + $0x50] sm:$0xff]  ;;  %s718_s13 = scalar_lea.vmem %s396_s3, 128  ;;  %p723_p7 = scmp.lt.s32.totalorder %s396_s3, %s396_s3 }
  0x36   :  { %490 = vmatprep.subr.mxu0 %v774_v0  ;;  %525 = vmatprep.subr.mxu1 %v774_v0  ;;  %v864_v12 = vld [vmem:[#allocation5 + $0x50] sm:$0xff]  ;;  %v870_v13 = vld [vmem:[#allocation2 + $0x48] sm:$0xff]  ;;  %v878_v15 = vld [vmem:[#allocation2 + $0x40] sm:$0xff]  ;;  %p719_p6 = scmp.ne.s32.totalorder %s396_s3, %s718_s13  ;;  %p724_p8 = scmp.lt.s32.totalorder %s718_s13, %s718_s13 }
  0x37   :  { %491 = vmatpush3.msra.mxu0 %v830_v3  ;;  %526 = vmatpush3.msra.mxu1 %v834_v4  ;;  %v872_v14 = vld [vmem:[#allocation5 + $0x48] sm:$0xff]  ;;  %v880_v16 = vld [vmem:[#allocation5 + $0x40] sm:$0xff]  ;;  %v886_v17 = vld [vmem:[#allocation2 + $0x38] sm:$0xff] }
  0x38   :  { %492 = vmatprep.subr.mxu0 %v774_v0  ;;  %527 = vmatprep.subr.mxu1 %v774_v0  ;;  %v888_v18 = vld [vmem:[#allocation5 + $0x38] sm:$0xff]  ;;  %v894_v19 = vld [vmem:[#allocation2 + $0x30] sm:$0xff]  ;;  %v902_v21 = vld [vmem:[#allocation2 + $0x28] sm:$0xff]  ;;  %p725_p9 = por %p724_p8, %p723_p7 }
  0x39   :  { %493 = vmatpush3.msra.mxu0 %v838_v5  ;;  %528 = vmatpush3.msra.mxu1 %v840_v6  ;;  %v896_v20 = vld [vmem:[#allocation5 + $0x30] sm:$0xff]  ;;  %v904_v22 = vld [vmem:[#allocation5 + $0x28] sm:$0xff]  ;;  %v910_v23 = vld [vmem:[#allocation2 + $0x20] sm:$0xff] }
  0x3a   :  { %494 = vmatprep.subr.mxu0 %v774_v0  ;;  %529 = vmatprep.subr.mxu1 %v774_v0  ;;  %v912_v24 = vld [vmem:[#allocation5 + $0x20] sm:$0xff]  ;;  %v918_v25 = vld [vmem:[#allocation2 + $0x18] sm:$0xff]  ;;  %v926_v27 = vld [vmem:[#allocation2 + $0x10] sm:$0xff]  ;;  %p726_p10 = pnand %p725_p9, %p719_p6 }
  0x3b   :  { %495 = vmatpush3.msra.mxu0 %v846_v7  ;;  %530 = vmatpush3.msra.mxu1 %v848_v8  ;;  %v920_v26 = vld [vmem:[#allocation5 + $0x18] sm:$0xff]  ;;  %v928_v28 = vld [vmem:[#allocation5 + $0x10] sm:$0xff]  ;;  %v934_v29 = vld [vmem:[#allocation2 + $0x8] sm:$0xff] }
  0x3c   :  { %496 = vmatprep.subr.mxu0 %v774_v0  ;;  %531 = vmatprep.subr.mxu1 %v774_v0  ;;  %v936_v30 = vld [vmem:[#allocation5 + $0x8] sm:$0xff]  ;;  %v942_v31 = vld [vmem:[#allocation2] sm:$0xff] }
  0x3d   :  { %497 = vmatpush3.msra.mxu0 %v854_v9  ;;  %532 = vmatpush3.msra.mxu1 %v856_v10  ;;  %v944_v32 = vld [vmem:[#allocation5] sm:$0xff]  ;;  %v950_v34 = vld [vmem:[#allocation8] sm:$0xff] }
  0x3e   :  { %498 = vmatprep.subr.mxu0 %v774_v0  ;;  %533 = vmatprep.subr.mxu1 %v774_v0  ;;  %v948_v33 = vld [vmem:[#allocation7] sm:$0xff] }
  0x3f   :  { %499 = vmatpush3.msra.mxu0 %v862_v11  ;;  %534 = vmatpush3.msra.mxu1 %v864_v12 }
  0x40   :  { %500 = vmatprep.subr.mxu0 %v774_v0  ;;  %535 = vmatprep.subr.mxu1 %v774_v0 }
  0x41   :  { %501 = vmatpush3.msra.mxu0 %v870_v13  ;;  %536 = vmatpush3.msra.mxu1 %v872_v14 }
  0x42   :  { %502 = vmatprep.subr.mxu0 %v774_v0  ;;  %537 = vmatprep.subr.mxu1 %v774_v0 }
  0x43   :  { %503 = vmatpush3.msra.mxu0 %v878_v15  ;;  %538 = vmatpush3.msra.mxu1 %v880_v16 }
  0x44   :  { %504 = vmatprep.subr.mxu0 %v774_v0  ;;  %539 = vmatprep.subr.mxu1 %v774_v0 }
  0x45   :  { %505 = vmatpush3.msra.mxu0 %v886_v17  ;;  %540 = vmatpush3.msra.mxu1 %v888_v18 }
  0x46   :  { %506 = vmatprep.subr.mxu0 %v774_v0  ;;  %541 = vmatprep.subr.mxu1 %v774_v0 }
  0x47   :  { %507 = vmatpush3.msra.mxu0 %v894_v19  ;;  %542 = vmatpush3.msra.mxu1 %v896_v20 }
  0x48   :  { %508 = vmatprep.subr.mxu0 %v774_v0  ;;  %543 = vmatprep.subr.mxu1 %v774_v0 }
  0x49   :  { %509 = vmatpush3.msra.mxu0 %v902_v21  ;;  %544 = vmatpush3.msra.mxu1 %v904_v22 }
  0x4a   :  { %510 = vmatprep.subr.mxu0 %v774_v0  ;;  %545 = vmatprep.subr.mxu1 %v774_v0 }
  0x4b   :  { %511 = vmatpush3.msra.mxu0 %v910_v23  ;;  %546 = vmatpush3.msra.mxu1 %v912_v24 }
  0x4c   :  { %512 = vmatprep.subr.mxu0 %v774_v0  ;;  %547 = vmatprep.subr.mxu1 %v774_v0 }
  0x4d   :  { %513 = vmatpush3.msra.mxu0 %v918_v25  ;;  %548 = vmatpush3.msra.mxu1 %v920_v26 }
  0x4e   :  { %514 = vmatprep.subr.mxu0 %v774_v0  ;;  %549 = vmatprep.subr.mxu1 %v774_v0 }
  0x4f   :  { %515 = vmatpush3.msra.mxu0 %v926_v27  ;;  %550 = vmatpush3.msra.mxu1 %v928_v28 }
  0x50   :  { %516 = vmatprep.subr.mxu0 %v774_v0  ;;  %551 = vmatprep.subr.mxu1 %v774_v0 }
  0x51   :  { %517 = vmatpush3.msra.mxu0 %v934_v29  ;;  %552 = vmatpush3.msra.mxu1 %v936_v30 }
  0x52   :  { %518 = vmatprep.subr.mxu0 %v774_v0  ;;  %553 = vmatprep.subr.mxu1 %v774_v0 }
  0x53   :  { %519 = vmatpush3.msra.mxu0 %v942_v31  ;;  %554 = vmatpush3.msra.mxu1 %v944_v32 }
  0x54   :  { %521 = vmatmul.mubr.f32.vlgmr.msra.gmra.mxu0 %v948_v33  ;;  %556 = vmatmul.mubr.f32.vlgmr.msra.gmra.mxu1 %v950_v34 }
  0x55   :  { %558 = vmatprep.subr.mxu0 %v774_v0  ;;  %593 = vmatprep.subr.mxu1 %v774_v0 }
  0x56   :  { %559 = vmatpush3.msra.mxu0 %v826_v1  ;;  %594 = vmatpush3.msra.mxu1 %v828_v2 }
  0x57   :  { %560 = vmatprep.subr.mxu0 %v774_v0  ;;  %595 = vmatprep.subr.mxu1 %v774_v0 }
  0x58   :  { %561 = vmatpush3.msra.mxu0 %v830_v3  ;;  %596 = vmatpush3.msra.mxu1 %v834_v4 }
  0x59   :  { %562 = vmatprep.subr.mxu0 %v774_v0  ;;  %597 = vmatprep.subr.mxu1 %v774_v0 }
  0x5a   :  { %563 = vmatpush3.msra.mxu0 %v838_v5  ;;  %598 = vmatpush3.msra.mxu1 %v840_v6 }
  0x5b   :  { %564 = vmatprep.subr.mxu0 %v774_v0  ;;  %599 = vmatprep.subr.mxu1 %v774_v0 }
  0x5c   :  { %565 = vmatpush3.msra.mxu0 %v846_v7  ;;  %600 = vmatpush3.msra.mxu1 %v848_v8 }
  0x5d   :  { %566 = vmatprep.subr.mxu0 %v774_v0  ;;  %601 = vmatprep.subr.mxu1 %v774_v0 }
  0x5e   :  { %567 = vmatpush3.msra.mxu0 %v854_v9  ;;  %602 = vmatpush3.msra.mxu1 %v856_v10 }
  0x5f   :  { %568 = vmatprep.subr.mxu0 %v774_v0  ;;  %603 = vmatprep.subr.mxu1 %v774_v0 }
  0x60   :  { %569 = vmatpush3.msra.mxu0 %v862_v11  ;;  %604 = vmatpush3.msra.mxu1 %v864_v12 }
  0x61   :  { %570 = vmatprep.subr.mxu0 %v774_v0  ;;  %605 = vmatprep.subr.mxu1 %v774_v0 }
  0x62   :  { %571 = vmatpush3.msra.mxu0 %v870_v13  ;;  %606 = vmatpush3.msra.mxu1 %v872_v14 }
  0x63   :  { %572 = vmatprep.subr.mxu0 %v774_v0  ;;  %607 = vmatprep.subr.mxu1 %v774_v0 }
  0x64   :  { %573 = vmatpush3.msra.mxu0 %v878_v15  ;;  %608 = vmatpush3.msra.mxu1 %v880_v16 }
  0x65   :  { %574 = vmatprep.subr.mxu0 %v774_v0  ;;  %609 = vmatprep.subr.mxu1 %v774_v0 }
  0x66   :  { %575 = vmatpush3.msra.mxu0 %v886_v17  ;;  %610 = vmatpush3.msra.mxu1 %v888_v18 }
  0x67   :  { %576 = vmatprep.subr.mxu0 %v774_v0  ;;  %611 = vmatprep.subr.mxu1 %v774_v0 }
  0x68   :  { %577 = vmatpush3.msra.mxu0 %v894_v19  ;;  %612 = vmatpush3.msra.mxu1 %v896_v20 }
  0x69   :  { %578 = vmatprep.subr.mxu0 %v774_v0  ;;  %613 = vmatprep.subr.mxu1 %v774_v0 }
  0x6a   :  { %579 = vmatpush3.msra.mxu0 %v902_v21  ;;  %614 = vmatpush3.msra.mxu1 %v904_v22 }
  0x6b   :  { %580 = vmatprep.subr.mxu0 %v774_v0  ;;  %615 = vmatprep.subr.mxu1 %v774_v0 }
  0x6c   :  { %581 = vmatpush3.msra.mxu0 %v910_v23  ;;  %616 = vmatpush3.msra.mxu1 %v912_v24 }
  0x6d   :  { %582 = vmatprep.subr.mxu0 %v774_v0  ;;  %617 = vmatprep.subr.mxu1 %v774_v0 }
  0x6e   :  { %583 = vmatpush3.msra.mxu0 %v918_v25  ;;  %618 = vmatpush3.msra.mxu1 %v920_v26 }
  0x6f   :  { %584 = vmatprep.subr.mxu0 %v774_v0  ;;  %619 = vmatprep.subr.mxu1 %v774_v0 }
  0x70   :  { %585 = vmatpush3.msra.mxu0 %v926_v27  ;;  %620 = vmatpush3.msra.mxu1 %v928_v28 }
  0x71   :  { %586 = vmatprep.subr.mxu0 %v774_v0  ;;  %621 = vmatprep.subr.mxu1 %v774_v0 }
  0x72   :  { %587 = vmatpush3.msra.mxu0 %v934_v29  ;;  %622 = vmatpush3.msra.mxu1 %v936_v30 }
  0x73   :  { %588 = vmatprep.subr.mxu0 %v774_v0  ;;  %623 = vmatprep.subr.mxu1 %v774_v0 }
  0x74   :  { %589 = vmatpush3.msra.mxu0 %v942_v31  ;;  %590 = vmatprep.mubr.msk.f32.mxu0 %vm775_vm0, %v774_v0 }
  0x75   :  { %624 = vmatpush3.msra.mxu1 %v944_v32  ;;  %625 = vmatprep.mubr.msk.f32.mxu1 %vm775_vm0, %v774_v0 }
  0x76   :  { %591 = vmatmul.mubr.f32.vlgmr.msra.gmra.mxu0 %v950_v34  ;;  %626 = vmatmul.mubr.f32.vlgmr.msra.gmra.mxu1 %v948_v33 }
 0x114   :  { %v172_v35 = vpop.f32.mrf.mxu0  ;;  %v242_v36 = vpop.f32.mrf.mxu1 }
 0x115   :  { %v246_v37 = vsub.f32 %v172_v35, %v242_v36 }
 0x116   :  { %v522_v38 = vpop.f32.mrf.mxu0  ;;  %v557_v39 = vpop.f32.mrf.mxu1 }
 0x117   :  { %387 = vst [vmem:[#allocation10] sm:$0xff] %v246_v37 }
 0x118   :  { %729 = shalt.err (!%p726_p10)
}
 0x119   :  { %398 = dma.vmem_to_hbm [thread:$0]  %s396_s3, 128, %s1038_s4, [#allocation4]  }
 0x11a   :  { %s777_s16 = smov [#allocation11]  }
 0x11b   :  { %s405_s17 = sshll.u32 %s777_s16, 4  ;;  %s406_s17 = int_to_ptr.vmem [resolvable:$true] %s405_s17 }
 0x11c   :  { %s738_s18 = scalar_lea.vmem %s406_s17, 128  ;;  %p743_p12 = scmp.lt.s32.totalorder %s406_s17, %s406_s17 }
 0x11d   :  { %p739_p11 = scmp.ne.s32.totalorder %s406_s17, %s738_s18  ;;  %p744_p13 = scmp.lt.s32.totalorder %s738_s18, %s738_s18 }
 0x11f   :  { %p745_p0 = por %p744_p13, %p743_p12 }
 0x121   :  { %p746_p1 = pnand %p745_p0, %p739_p11 }
 0x136   :  { %v313_v40 = vpop.f32.mrf.mxu0  ;;  %v383_v41 = vpop.f32.mrf.mxu1 }
 0x137   :  { %v384_v42 = vadd.f32 %v383_v41, %v313_v40 }
 0x138   :  { %v592_v43 = vpop.f32.mrf.mxu0  ;;  %v627_v44 = vpop.f32.mrf.mxu1 }
 0x139   :  { %388 = vst [vmem:[#allocation11] sm:$0xff] %v384_v42 }
 0x13a   :  { %749 = shalt.err (!%p746_p1)
}
 0x13b   :  { %408 = dma.vmem_to_hbm [thread:$0]  %s406_s17, 128, %s1039_s5, [#allocation12]  }
 0x13c   :  { %764 = dma.done.wait [#allocation4], 128  }
 0x13d   :  { %765 = vsyncadd [#allocation4], 4294967168 }
 0x13e   :  { %766 = dma.done.wait [#allocation12], 128  }
 0x13f   :  { %767 = vsyncadd [#allocation12], 4294967168 }
 0x140   :  { %415 = vsyncpa [#allocation3], 1 }
 0x141   :  { %416 = vsyncpa [#allocation6], 1 }
 0x142   :  { %417 = vsyncpa [#allocation9], 1 }
 0x143   :  { %418 = vsyncpa [#allocation4], 1 }
 0x144   :  { %419 = vsyncpa [#allocation12], 1 }

</bundles_post_ra>
